<compile_context>
chip_gen: v7x
topology: tpu7x:2x2x1
jax: 0.10.0
libtpu: 0.0.40
codegen_flags: <defaults>
</compile_context>

<pallas_src>
import functools

import jax
import jax.numpy as jnp
import numpy as np
from jax.experimental import pallas as pl
from jax.experimental.pallas import tpu as pltpu


def _round_up(x, m):
    return (x + m - 1) // m * m


# ----------------------------------------------------------------------------
# Fused kernel.  Grid = (batch_tiles,).  One grid step computes the full
# network for one batch tile: fused embed matmul + masked normalizations,
# then num_layers statically-unrolled Linear+ReLU layers on VMEM-resident
# weights, with the activation ping-ponged through a bf16 VMEM scratch.
# ----------------------------------------------------------------------------
def _mapping_kernel(zc_ref, we_ref, be_ref, w_ref, b_ref, o_ref, h_ref, *,
                    num_layers, half, f_pad, inv_half, eps):
    # ---- fused embed:  [z | c] @ blockdiag(Wz, Wc) + [bz | bc] -------------
    # Columns [0, half) hold z@Wz+bz, [half, 2*half) hold c@Wc+bc, rest zero.
    emb = jnp.dot(zc_ref[...], we_ref[...],
                  preferred_element_type=jnp.float32) + be_ref[...]

    col = jax.lax.broadcasted_iota(jnp.int32, (1, f_pad), 1)
    mz = (col < half).astype(jnp.float32)
    mc = ((col >= half) & (col < 2 * half)).astype(jnp.float32)

    e2 = emb * emb
    ssz = jnp.sum(e2 * mz, axis=1, keepdims=True)   # padded cols are exactly 0
    ssc = jnp.sum(e2 * mc, axis=1, keepdims=True)
    scale = (mz * jax.lax.rsqrt(ssz * inv_half + eps)
             + mc * jax.lax.rsqrt(ssc * inv_half + eps))
    # normalize_2nd_moment on each half; padded columns stay exactly 0.
    h_ref[...] = (emb * scale).astype(jnp.bfloat16)

    # ---- main: num_layers x (Linear + ReLU), weights resident in VMEM ------
    for l in range(num_layers):
        acc = jnp.dot(h_ref[...], w_ref[l],
                      preferred_element_type=jnp.float32) + b_ref[l]
        act = jnp.maximum(acc, 0.0)
        if l + 1 < num_layers:
            h_ref[...] = act.astype(jnp.bfloat16)
        else:
            o_ref[...] = act.astype(o_ref.dtype)   # single HBM writeback/tile


@functools.partial(jax.jit, static_argnames=("tile_m", "half"))
def _mapping_forward(zc, we, be, w_stack, b_stack, *, tile_m, half):
    m_pad, k_pad = zc.shape
    num_layers, f_pad, _ = w_stack.shape
    n_bt = m_pad // tile_m

    kernel = functools.partial(_mapping_kernel, num_layers=num_layers,
                               half=half, f_pad=f_pad,
                               inv_half=1.0 / half, eps=1e-8)

    flops = 2 * m_pad * f_pad * (k_pad + num_layers * f_pad)
    bytes_accessed = (zc.size * 2 + we.size * 2 + be.size * 4
                      + w_stack.size * 2 + b_stack.size * 4
                      + m_pad * f_pad * 4)

    return pl.pallas_call(
        kernel,
        out_shape=jax.ShapeDtypeStruct((m_pad, f_pad), jnp.float32),
        grid=(n_bt,),
        in_specs=[
            pl.BlockSpec((tile_m, k_pad), lambda bi: (bi, 0)),           # [z|c] bf16
            pl.BlockSpec((k_pad, f_pad), lambda bi: (0, 0)),             # We bf16
            pl.BlockSpec((1, f_pad), lambda bi: (0, 0)),                 # be f32
            pl.BlockSpec((num_layers, f_pad, f_pad), lambda bi: (0, 0, 0)),  # W stack
            pl.BlockSpec((num_layers, 1, f_pad), lambda bi: (0, 0, 0)),      # b stack
        ],
        out_specs=pl.BlockSpec((tile_m, f_pad), lambda bi: (bi, 0)),
        scratch_shapes=[pltpu.VMEM((tile_m, f_pad), jnp.bfloat16)],     # activation
        compiler_params=pltpu.CompilerParams(
            dimension_semantics=("parallel",),
            vmem_limit_bytes=64 * 1024 * 1024),
        cost_estimate=pl.CostEstimate(
            flops=int(flops),
            transcendentals=int(2 * m_pad),
            bytes_accessed=int(bytes_accessed)),
    )(zc, we, be, w_stack, b_stack)


# ----------------------------------------------------------------------------
# Parameter construction (deterministic, PyTorch-Linear-like uniform init).
# Weights are stored pre-transposed as [in, out].
# ----------------------------------------------------------------------------
def _init_linear(key, in_f, out_f):
    kw, kb = jax.random.split(key)
    bound = 1.0 / np.sqrt(in_f)
    w = jax.random.uniform(kw, (in_f, out_f), jnp.float32, -bound, bound)
    b = jax.random.uniform(kb, (out_f,), jnp.float32, -bound, bound)
    return w, b


class MappingNetworkPallas:
    def __init__(self, key, z_dim, c_dim, w_dim, num_layers=8,
                 embed_features=512, layer_features=512):
        if embed_features is None:
            embed_features = w_dim
        if layer_features is None:
            layer_features = w_dim
        if c_dim == 0:
            # TODO(synk): c_dim == 0 makes the reference module degenerate
            # (embed_features -> 0, Linear(z_dim, 0), empty concat); not
            # supported by the fused kernel.
            raise NotImplementedError("c_dim == 0 is not supported")
        assert embed_features % 2 == 0, "embed_features must be even"

        self.z_dim, self.c_dim, self.w_dim = z_dim, c_dim, w_dim
        self.num_layers = num_layers
        self.half = embed_features // 2
        e_cat = 2 * self.half

        features = [e_cat] + [layer_features] * (num_layers - 1) + [w_dim]
        self.f_pad = _round_up(max(features), 128)
        self.kz_pad = _round_up(z_dim, 128)
        self.kc_pad = _round_up(c_dim, 128)
        self.k_pad = self.kz_pad + self.kc_pad

        keys = jax.random.split(key, num_layers + 2)

        # Raw (unpadded, f32) params, kept for the pure-JAX reference.
        self.wz_raw, self.bz_raw = _init_linear(keys[0], z_dim, self.half)
        self.wc_raw, self.bc_raw = _init_linear(keys[1], c_dim, self.half)
        self.main_raw = [
            _init_linear(keys[2 + i], features[i], features[i + 1])
            for i in range(num_layers)
        ]

        # --- packed / padded params built ONCE at init (bf16 weights) --------
        # INVARIANT: padded rows/cols are exactly zero (see header comment).
        f_pad, half = self.f_pad, self.half
        we = jnp.zeros((self.k_pad, f_pad), jnp.bfloat16)
        we = we.at[:z_dim, :half].set(self.wz_raw.astype(jnp.bfloat16))
        we = we.at[self.kz_pad:self.kz_pad + c_dim, half:e_cat].set(
            self.wc_raw.astype(jnp.bfloat16))
        self.we_p = we
        be = jnp.zeros((1, f_pad), jnp.float32)
        self.be_p = be.at[0, :half].set(self.bz_raw).at[0, half:e_cat].set(self.bc_raw)

        w_stack = jnp.zeros((num_layers, f_pad, f_pad), jnp.bfloat16)
        b_stack = jnp.zeros((num_layers, 1, f_pad), jnp.float32)
        for i, (w, b) in enumerate(self.main_raw):
            kin, kout = features[i], features[i + 1]
            w_stack = w_stack.at[i, :kin, :kout].set(w.astype(jnp.bfloat16))
            b_stack = b_stack.at[i, 0, :kout].set(b)
        self.w_stack = w_stack
        self.b_stack = b_stack

    @staticmethod
    def _choose_tiling(m):
        # Round batch minimally (multiple of 16 for bf16 sublane packing);
        # keep >=2 'parallel' tiles when the batch allows (v7x megacore),
        # 512-row tiles for large batches.
        m_pad = _round_up(max(m, 16), 16)
        if m_pad > 1024:
            tile_m = 512
            m_pad = _round_up(m_pad, tile_m)
        elif m_pad >= 256 and m_pad % 32 == 0:
            tile_m = m_pad // 2
        else:
            tile_m = m_pad
        return m_pad, tile_m

    def __call__(self, z, c):
        m = z.shape[0]
        m_pad, tile_m = self._choose_tiling(m)

        # Pad + cast inputs to bf16 (they are only consumed as MXU operands).
        z_b = jnp.pad(z.astype(jnp.float32).astype(jnp.bfloat16),
                      ((0, 0), (0, self.kz_pad - self.z_dim)))
        c_b = jnp.pad(c.astype(jnp.float32).astype(jnp.bfloat16),
                      ((0, 0), (0, self.kc_pad - self.c_dim)))
        zc = jnp.pad(jnp.concatenate([z_b, c_b], axis=1),
                     ((0, m_pad - m), (0, 0)))

        out = _mapping_forward(zc, self.we_p, self.be_p,
                               self.w_stack, self.b_stack,
                               tile_m=tile_m, half=self.half)
        return out[:m, :self.w_dim]


# ----------------------------------------------------------------------------
# Pure-JAX reference emulating the kernel's precision (bf16 MXU operands and
# bf16 inter-layer activations, f32 accumulation / elementwise); same math as
# the PyTorch module.
# ----------------------------------------------------------------------------
def reference_forward(net, z, c):
    def lin_bf16(x, w, b):
        return jnp.dot(x.astype(jnp.bfloat16), w.astype(jnp.bfloat16),
                       preferred_element_type=jnp.float32) + b

    x = lin_bf16(z.astype(jnp.float32), net.wz_raw, net.bz_raw)
    x = x * jax.lax.rsqrt(jnp.mean(x * x, axis=1, keepdims=True) + 1e-8)
    y = lin_bf16(c.astype(jnp.float32), net.wc_raw, net.bc_raw)
    y = y * jax.lax.rsqrt(jnp.mean(y * y, axis=1, keepdims=True) + 1e-8)
    h = jnp.concatenate([x, y], axis=1)
    for (w, b) in net.main_raw:
        h = jnp.maximum(lin_bf16(h, w, b), 0.0)
    return h


if __name__ == "__main__":
    key = jax.random.PRNGKey(0)
    k_param, k_z, k_c = jax.random.split(key, 3)

    # Small, module-consistent shapes.
    batch, z_dim, c_dim, w_dim = 8, 32, 16, 32
    num_layers, embed_features, layer_features = 4, 64, 64

    net = MappingNetworkPallas(k_param, z_dim, c_dim, w_dim,
                               num_layers=num_layers,
                               embed_features=embed_features,
                               layer_features=layer_features)

    z = jax.random.normal(k_z, (batch, z_dim), jnp.float32)
    c = jax.random.normal(k_c, (batch, c_dim), jnp.float32)

    out = jax.block_until_ready(net(z, c))
    ref = jax.block_until_ready(reference_forward(net, z, c))

    assert out.shape == (batch, w_dim), out.shape
    err = np.max(np.abs(np.asarray(out) - np.asarray(ref)))
    assert np.allclose(np.asarray(out), np.asarray(ref),
                       rtol=1e-2, atol=1e-2), err

    print("KERNEL_OK")
</pallas_src>

<mosaic_0001>
module attributes {stable_mosaic.version = 11 : i64} {
  func.func @_mapping_kernel(%arg0: i32, %arg1: memref<16x256xbf16, #tpu.memory_space<vmem>>, %arg2: memref<256x128xbf16, #tpu.memory_space<vmem>>, %arg3: memref<1x128xf32, #tpu.memory_space<vmem>>, %arg4: memref<4x128x128xbf16, #tpu.memory_space<vmem>>, %arg5: memref<4x1x128xf32, #tpu.memory_space<vmem>>, %arg6: memref<16x128xf32, #tpu.memory_space<vmem>>, %arg7: memref<16x128xbf16, #tpu.memory_space<vmem>>) attributes {dimension_semantics = [#tpu.dimension_semantics<parallel>], iteration_bounds = array<i64: 1>, scalar_prefetch = 0 : i64, scratch_operands = 1 : i64, tpu.core_type = #tpu.core_type<tc>, window_params = [{transform_indices = @transform_0, window_bounds = array<i64: 16, 256>}, {pipeline_mode = #tpu.pipeline_mode<synchronous>, transform_indices = @transform_1, window_bounds = array<i64: 256, 128>}, {pipeline_mode = #tpu.pipeline_mode<synchronous>, transform_indices = @transform_2, window_bounds = array<i64: 1, 128>}, {pipeline_mode = #tpu.pipeline_mode<synchronous>, transform_indices = @transform_3, window_bounds = array<i64: 4, 128, 128>}, {pipeline_mode = #tpu.pipeline_mode<synchronous>, transform_indices = @transform_4, window_bounds = array<i64: 4, 1, 128>}, {transform_indices = @transform_5, window_bounds = array<i64: 16, 128>}]} {
    %c0 = arith.constant 0 : index
    %c0_0 = arith.constant 0 : index
    %0 = vector.load %arg1[%c0, %c0_0] : memref<16x256xbf16, #tpu.memory_space<vmem>>, vector<16x256xbf16>
    %c0_1 = arith.constant 0 : index
    %c0_2 = arith.constant 0 : index
    %1 = vector.load %arg2[%c0_1, %c0_2] : memref<256x128xbf16, #tpu.memory_space<vmem>>, vector<256x128xbf16>
    %cst = arith.constant dense<0.000000e+00> : vector<16x128xf32>
    %2 = tpu.matmul %0, %1, %cst {dimension_numbers = #tpu.dot_dimension_numbers<[1], [0], [0], [1], [0, 0, 1, 1], [], []>} : vector<16x256xbf16>, vector<256x128xbf16>, vector<16x128xf32> -> vector<16x128xf32>
    %c0_3 = arith.constant 0 : index
    %c0_4 = arith.constant 0 : index
    %3 = vector.load %arg3[%c0_3, %c0_4] : memref<1x128xf32, #tpu.memory_space<vmem>>, vector<1x128xf32>
    %4 = vector.broadcast %3 : vector<1x128xf32> to vector<16x128xf32>
    %5 = arith.addf %2, %4 : vector<16x128xf32>
    %6 = tpu.iota {dimensions = array<i32: 1>} : vector<1x128xi32>
    %c32_i32 = arith.constant 32 : i32
    %7 = vector.broadcast %c32_i32 : i32 to vector<1x128xi32>
    %8 = arith.cmpi slt, %6, %7 : vector<1x128xi32>
    %9 = arith.extui %8 : vector<1x128xi1> to vector<1x128xi32>
    %10 = arith.sitofp %9 : vector<1x128xi32> to vector<1x128xf32>
    %c32_i32_5 = arith.constant 32 : i32
    %11 = vector.broadcast %c32_i32_5 : i32 to vector<1x128xi32>
    %12 = arith.cmpi sge, %6, %11 : vector<1x128xi32>
    %c64_i32 = arith.constant 64 : i32
    %13 = vector.broadcast %c64_i32 : i32 to vector<1x128xi32>
    %14 = arith.cmpi slt, %6, %13 : vector<1x128xi32>
    %15 = arith.andi %12, %14 : vector<1x128xi1>
    %16 = arith.extui %15 : vector<1x128xi1> to vector<1x128xi32>
    %17 = arith.sitofp %16 : vector<1x128xi32> to vector<1x128xf32>
    %18 = arith.mulf %5, %5 : vector<16x128xf32>
    %19 = vector.broadcast %10 : vector<1x128xf32> to vector<16x128xf32>
    %20 = arith.mulf %18, %19 : vector<16x128xf32>
    %cst_6 = arith.constant dense<0.000000e+00> : vector<16xf32>
    %21 = vector.multi_reduction <add>, %20, %cst_6 [1] : vector<16x128xf32> to vector<16xf32>
    %22 = vector.shape_cast %21 : vector<16xf32> to vector<16x1xf32>
    %23 = vector.broadcast %17 : vector<1x128xf32> to vector<16x128xf32>
    %24 = arith.mulf %18, %23 : vector<16x128xf32>
    %cst_7 = arith.constant dense<0.000000e+00> : vector<16xf32>
    %25 = vector.multi_reduction <add>, %24, %cst_7 [1] : vector<16x128xf32> to vector<16xf32>
    %26 = vector.shape_cast %25 : vector<16xf32> to vector<16x1xf32>
    %cst_8 = arith.constant 3.125000e-02 : f32
    %27 = vector.broadcast %cst_8 : f32 to vector<16x1xf32>
    %28 = arith.mulf %22, %27 : vector<16x1xf32>
    %cst_9 = arith.constant 9.99999993E-9 : f32
    %29 = vector.broadcast %cst_9 : f32 to vector<16x1xf32>
    %30 = arith.addf %28, %29 : vector<16x1xf32>
    %31 = math.rsqrt %30 : vector<16x1xf32>
    %32 = vector.broadcast %10 : vector<1x128xf32> to vector<16x128xf32>
    %33 = vector.broadcast %31 : vector<16x1xf32> to vector<16x128xf32>
    %34 = arith.mulf %32, %33 : vector<16x128xf32>
    %cst_10 = arith.constant 3.125000e-02 : f32
    %35 = vector.broadcast %cst_10 : f32 to vector<16x1xf32>
    %36 = arith.mulf %26, %35 : vector<16x1xf32>
    %cst_11 = arith.constant 9.99999993E-9 : f32
    %37 = vector.broadcast %cst_11 : f32 to vector<16x1xf32>
    %38 = arith.addf %36, %37 : vector<16x1xf32>
    %39 = math.rsqrt %38 : vector<16x1xf32>
    %40 = vector.broadcast %17 : vector<1x128xf32> to vector<16x128xf32>
    %41 = vector.broadcast %39 : vector<16x1xf32> to vector<16x128xf32>
    %42 = arith.mulf %40, %41 : vector<16x128xf32>
    %43 = arith.addf %34, %42 : vector<16x128xf32>
    %44 = arith.mulf %5, %43 : vector<16x128xf32>
    %45 = arith.truncf %44 : vector<16x128xf32> to vector<16x128xbf16>
    %c0_12 = arith.constant 0 : index
    %c0_13 = arith.constant 0 : index
    %46 = vector.load %arg7[%c0_12, %c0_13] : memref<16x128xbf16, #tpu.memory_space<vmem>>, vector<16x128xbf16>
    tpu.vector_store %arg7[%c0_12, %c0_13], %45 {strides = array<i32>} : memref<16x128xbf16, #tpu.memory_space<vmem>>, vector<16x128xbf16>,
    %c0_14 = arith.constant 0 : index
    %c0_15 = arith.constant 0 : index
    %47 = vector.load %arg7[%c0_14, %c0_15] : memref<16x128xbf16, #tpu.memory_space<vmem>>, vector<16x128xbf16>
    %c0_16 = arith.constant 0 : index
    %c0_17 = arith.constant 0 : index
    %c0_18 = arith.constant 0 : index
    %48 = vector.load %arg4[%c0_16, %c0_17, %c0_18] : memref<4x128x128xbf16, #tpu.memory_space<vmem>>, vector<1x128x128xbf16>
    %49 = vector.shape_cast %48 : vector<1x128x128xbf16> to vector<128x128xbf16>
    %cst_19 = arith.constant dense<0.000000e+00> : vector<16x128xf32>
    %50 = tpu.matmul %47, %49, %cst_19 {dimension_numbers = #tpu.dot_dimension_numbers<[1], [0], [0], [1], [0, 0, 1, 1], [], []>} : vector<16x128xbf16>, vector<128x128xbf16>, vector<16x128xf32> -> vector<16x128xf32>
    %c0_20 = arith.constant 0 : index
    %c0_21 = arith.constant 0 : index
    %c0_22 = arith.constant 0 : index
    %51 = vector.load %arg5[%c0_20, %c0_21, %c0_22] : memref<4x1x128xf32, #tpu.memory_space<vmem>>, vector<1x1x128xf32>
    %52 = vector.shape_cast %51 : vector<1x1x128xf32> to vector<1x128xf32>
    %53 = vector.broadcast %52 : vector<1x128xf32> to vector<16x128xf32>
    %54 = arith.addf %50, %53 : vector<16x128xf32>
    %cst_23 = arith.constant 0.000000e+00 : f32
    %55 = vector.broadcast %cst_23 : f32 to vector<16x128xf32>
    %56 = arith.maximumf %54, %55 : vector<16x128xf32>
    %57 = arith.truncf %56 : vector<16x128xf32> to vector<16x128xbf16>
    %c0_24 = arith.constant 0 : index
    %c0_25 = arith.constant 0 : index
    %58 = vector.load %arg7[%c0_24, %c0_25] : memref<16x128xbf16, #tpu.memory_space<vmem>>, vector<16x128xbf16>
    tpu.vector_store %arg7[%c0_24, %c0_25], %57 {strides = array<i32>} : memref<16x128xbf16, #tpu.memory_space<vmem>>, vector<16x128xbf16>,
    %c0_26 = arith.constant 0 : index
    %c0_27 = arith.constant 0 : index
    %59 = vector.load %arg7[%c0_26, %c0_27] : memref<16x128xbf16, #tpu.memory_space<vmem>>, vector<16x128xbf16>
    %c1 = arith.constant 1 : index
    %c0_28 = arith.constant 0 : index
    %c0_29 = arith.constant 0 : index
    %60 = vector.load %arg4[%c1, %c0_28, %c0_29] : memref<4x128x128xbf16, #tpu.memory_space<vmem>>, vector<1x128x128xbf16>
    %61 = vector.shape_cast %60 : vector<1x128x128xbf16> to vector<128x128xbf16>
    %cst_30 = arith.constant dense<0.000000e+00> : vector<16x128xf32>
    %62 = tpu.matmul %59, %61, %cst_30 {dimension_numbers = #tpu.dot_dimension_numbers<[1], [0], [0], [1], [0, 0, 1, 1], [], []>} : vector<16x128xbf16>, vector<128x128xbf16>, vector<16x128xf32> -> vector<16x128xf32>
    %c1_31 = arith.constant 1 : index
    %c0_32 = arith.constant 0 : index
    %c0_33 = arith.constant 0 : index
    %63 = vector.load %arg5[%c1_31, %c0_32, %c0_33] : memref<4x1x128xf32, #tpu.memory_space<vmem>>, vector<1x1x128xf32>
    %64 = vector.shape_cast %63 : vector<1x1x128xf32> to vector<1x128xf32>
    %65 = vector.broadcast %64 : vector<1x128xf32> to vector<16x128xf32>
    %66 = arith.addf %62, %65 : vector<16x128xf32>
    %cst_34 = arith.constant 0.000000e+00 : f32
    %67 = vector.broadcast %cst_34 : f32 to vector<16x128xf32>
    %68 = arith.maximumf %66, %67 : vector<16x128xf32>
    %69 = arith.truncf %68 : vector<16x128xf32> to vector<16x128xbf16>
    %c0_35 = arith.constant 0 : index
    %c0_36 = arith.constant 0 : index
    %70 = vector.load %arg7[%c0_35, %c0_36] : memref<16x128xbf16, #tpu.memory_space<vmem>>, vector<16x128xbf16>
    tpu.vector_store %arg7[%c0_35, %c0_36], %69 {strides = array<i32>} : memref<16x128xbf16, #tpu.memory_space<vmem>>, vector<16x128xbf16>,
    %c0_37 = arith.constant 0 : index
    %c0_38 = arith.constant 0 : index
    %71 = vector.load %arg7[%c0_37, %c0_38] : memref<16x128xbf16, #tpu.memory_space<vmem>>, vector<16x128xbf16>
    %c2 = arith.constant 2 : index
    %c0_39 = arith.constant 0 : index
    %c0_40 = arith.constant 0 : index
    %72 = vector.load %arg4[%c2, %c0_39, %c0_40] : memref<4x128x128xbf16, #tpu.memory_space<vmem>>, vector<1x128x128xbf16>
    %73 = vector.shape_cast %72 : vector<1x128x128xbf16> to vector<128x128xbf16>
    %cst_41 = arith.constant dense<0.000000e+00> : vector<16x128xf32>
    %74 = tpu.matmul %71, %73, %cst_41 {dimension_numbers = #tpu.dot_dimension_numbers<[1], [0], [0], [1], [0, 0, 1, 1], [], []>} : vector<16x128xbf16>, vector<128x128xbf16>, vector<16x128xf32> -> vector<16x128xf32>
    %c2_42 = arith.constant 2 : index
    %c0_43 = arith.constant 0 : index
    %c0_44 = arith.constant 0 : index
    %75 = vector.load %arg5[%c2_42, %c0_43, %c0_44] : memref<4x1x128xf32, #tpu.memory_space<vmem>>, vector<1x1x128xf32>
    %76 = vector.shape_cast %75 : vector<1x1x128xf32> to vector<1x128xf32>
    %77 = vector.broadcast %76 : vector<1x128xf32> to vector<16x128xf32>
    %78 = arith.addf %74, %77 : vector<16x128xf32>
    %cst_45 = arith.constant 0.000000e+00 : f32
    %79 = vector.broadcast %cst_45 : f32 to vector<16x128xf32>
    %80 = arith.maximumf %78, %79 : vector<16x128xf32>
    %81 = arith.truncf %80 : vector<16x128xf32> to vector<16x128xbf16>
    %c0_46 = arith.constant 0 : index
    %c0_47 = arith.constant 0 : index
    %82 = vector.load %arg7[%c0_46, %c0_47] : memref<16x128xbf16, #tpu.memory_space<vmem>>, vector<16x128xbf16>
    tpu.vector_store %arg7[%c0_46, %c0_47], %81 {strides = array<i32>} : memref<16x128xbf16, #tpu.memory_space<vmem>>, vector<16x128xbf16>,
    %c0_48 = arith.constant 0 : index
    %c0_49 = arith.constant 0 : index
    %83 = vector.load %arg7[%c0_48, %c0_49] : memref<16x128xbf16, #tpu.memory_space<vmem>>, vector<16x128xbf16>
    %c3 = arith.constant 3 : index
    %c0_50 = arith.constant 0 : index
    %c0_51 = arith.constant 0 : index
    %84 = vector.load %arg4[%c3, %c0_50, %c0_51] : memref<4x128x128xbf16, #tpu.memory_space<vmem>>, vector<1x128x128xbf16>
    %85 = vector.shape_cast %84 : vector<1x128x128xbf16> to vector<128x128xbf16>
    %cst_52 = arith.constant dense<0.000000e+00> : vector<16x128xf32>
    %86 = tpu.matmul %83, %85, %cst_52 {dimension_numbers = #tpu.dot_dimension_numbers<[1], [0], [0], [1], [0, 0, 1, 1], [], []>} : vector<16x128xbf16>, vector<128x128xbf16>, vector<16x128xf32> -> vector<16x128xf32>
    %c3_53 = arith.constant 3 : index
    %c0_54 = arith.constant 0 : index
    %c0_55 = arith.constant 0 : index
    %87 = vector.load %arg5[%c3_53, %c0_54, %c0_55] : memref<4x1x128xf32, #tpu.memory_space<vmem>>, vector<1x1x128xf32>
    %88 = vector.shape_cast %87 : vector<1x1x128xf32> to vector<1x128xf32>
    %89 = vector.broadcast %88 : vector<1x128xf32> to vector<16x128xf32>
    %90 = arith.addf %86, %89 : vector<16x128xf32>
    %cst_56 = arith.constant 0.000000e+00 : f32
    %91 = vector.broadcast %cst_56 : f32 to vector<16x128xf32>
    %92 = arith.maximumf %90, %91 : vector<16x128xf32>
    %c0_57 = arith.constant 0 : index
    %c0_58 = arith.constant 0 : index
    %93 = vector.load %arg6[%c0_57, %c0_58] : memref<16x128xf32, #tpu.memory_space<vmem>>, vector<16x128xf32>
    tpu.vector_store %arg6[%c0_57, %c0_58], %92 {strides = array<i32>} : memref<16x128xf32, #tpu.memory_space<vmem>>, vector<16x128xf32>,
    return
  }
  func.func @transform_0(%arg0: i32) -> (i32, i32) {
    %c0_i32 = arith.constant 0 : i32
    %c0_i32_0 = arith.constant 0 : i32
    return %arg0, %c0_i32 : i32, i32
  }
  func.func @transform_1(%arg0: i32) -> (i32, i32) {
    %c0_i32 = arith.constant 0 : i32
    %c0_i32_0 = arith.constant 0 : i32
    %c0_i32_1 = arith.constant 0 : i32
    return %c0_i32, %c0_i32_0 : i32, i32
  }
  func.func @transform_2(%arg0: i32) -> (i32, i32) {
    %c0_i32 = arith.constant 0 : i32
    %c0_i32_0 = arith.constant 0 : i32
    %c0_i32_1 = arith.constant 0 : i32
    return %c0_i32, %c0_i32_0 : i32, i32
  }
  func.func @transform_3(%arg0: i32) -> (i32, i32, i32) {
    %c0_i32 = arith.constant 0 : i32
    %c0_i32_0 = arith.constant 0 : i32
    %c0_i32_1 = arith.constant 0 : i32
    %c0_i32_2 = arith.constant 0 : i32
    return %c0_i32, %c0_i32_0, %c0_i32_1 : i32, i32, i32
  }
  func.func @transform_4(%arg0: i32) -> (i32, i32, i32) {
    %c0_i32 = arith.constant 0 : i32
    %c0_i32_0 = arith.constant 0 : i32
    %c0_i32_1 = arith.constant 0 : i32
    %c0_i32_2 = arith.constant 0 : i32
    return %c0_i32, %c0_i32_0, %c0_i32_1 : i32, i32, i32
  }
  func.func @transform_5(%arg0: i32) -> (i32, i32) {
    %c0_i32 = arith.constant 0 : i32
    %c0_i32_0 = arith.constant 0 : i32
    return %arg0, %c0_i32 : i32, i32
  }
}

</mosaic_0001>

<bundles_post_ra>
// kernel: _mapping_forward.1
= control target key start
LH: loop header
LB: loop body
LE: loop exit
PB: predicated region body
PF: predicated region fallthrough
CT: control target
= control target key end

     0   :  { %10 = vsyncpa [#allocation4], 0  ;;  %s1409_s0 = inlined_call_operand.hbm [shape: bf16[16,256], index: 0, kind: input, shape index: {}]   ;;  %s1410_s1 = inlined_call_operand.hbm [shape: bf16[256,128], index: 1, kind: input, shape index: {}]   ;;  %s1411_s2 = inlined_call_operand.hbm [shape: f32[1,128], index: 2, kind: input, shape index: {}]   ;;  %s1412_s3 = inlined_call_operand.hbm [shape: bf16[4,128,128], index: 3, kind: input, shape index: {}]   ;;  %s1413_s4 = inlined_call_operand.hbm [shape: f32[4,1,128], index: 4, kind: input, shape index: {}]   ;;  %s1414_s5 = inlined_call_operand.hbm [shape: f32[16,128], index: 5, kind: output, shape index: {}]  }
   0x1   :  { %11 = vsyncpa [#allocation7], 0 }
   0x2   :  { %12 = vsyncpa [#allocation10], 0 }
   0x3   :  { %13 = vsyncpa [#allocation5], 0  ;;  %s1223_s18 = smov [#allocation6]   ;;  %s1083_s22 = scalar_lea.hbm %s1410_s1, 2048 }
   0x4   :  { %s31_s19 = sshll.u32 %s1223_s18, 4  ;;  %p1084_p0 = scmp.ne.s32.totalorder %s1410_s1, %s1083_s22  ;;  %s32_s19 = int_to_ptr.vmem [resolvable:$true] %s31_s19 }
   0x5   :  { %p1087_p1 = scmp.lt.u32.totalorder %s1083_s22, %s1410_s1 }
   0x7   :  { %p1089_p2 = pnand %p1087_p1, %p1084_p0 }
   0x9   :  { %1092 = shalt.err (!%p1089_p2)
}
   0xa   :  { %s1093_s27 = scalar_lea.vmem %s32_s19, 2048  ;;  %p1098_p4 = scmp.lt.s32.totalorder %s32_s19, %s32_s19 }
   0xb   :  { %p1094_p3 = scmp.ne.s32.totalorder %s32_s19, %s1093_s27  ;;  %p1099_p5 = scmp.lt.s32.totalorder %s1093_s27, %s1093_s27 }
   0xd   :  { %p1100_p6 = por %p1099_p5, %p1098_p4 }
   0xf   :  { %p1101_p7 = pnand %p1100_p6, %p1094_p3 }
  0x11   :  { %1104 = shalt.err (!%p1101_p7)
}
  0x12   :  { %s1224_s28 = smov 64   ;;  %s1225_s29 = smov 4  }
  0x13   :  { %37 = dma.hbm_to_vmem [thread:$0]  %s1410_s1, 2048, %s32_s19, [#allocation7], %s1224_s28, %s1224_s28, %s1225_s29  }
  0x14   :  { %s1226_s7 = smov [#allocation9]   ;;  %s1227_s9 = smov [#allocation3]  }
  0x15   :  { %s53_s8 = sshll.u32 %s1226_s7, 4  ;;  %s19_s10 = sshll.u32 %s1227_s9, 4  ;;  %s54_s8 = int_to_ptr.vmem [resolvable:$true] %s53_s8  ;;  %s20_s10 = int_to_ptr.vmem [resolvable:$true] %s19_s10 }
  0x16   :  { %s1105_s13 = scalar_lea.hbm %s1412_s3, 4096 }
  0x17   :  { %p1106_p8 = scmp.ne.s32.totalorder %s1412_s3, %s1105_s13  ;;  %p1109_p9 = scmp.lt.u32.totalorder %s1105_s13, %s1412_s3 }
  0x19   :  { %p1111_p10 = pnand %p1109_p9, %p1106_p8 }
  0x1b   :  { %1114 = shalt.err (!%p1111_p10)
}
  0x1c   :  { %s1115_s1 = scalar_lea.vmem %s54_s8, 4096  ;;  %p1120_p12 = scmp.lt.s32.totalorder %s54_s8, %s54_s8 }
  0x1d   :  { %p1116_p11 = scmp.ne.s32.totalorder %s54_s8, %s1115_s1  ;;  %p1121_p13 = scmp.lt.s32.totalorder %s1115_s1, %s1115_s1 }
  0x1f   :  { %p1122_p0 = por %p1121_p13, %p1120_p12 }
  0x21   :  { %p1123_p1 = pnand %p1122_p0, %p1116_p11 }
  0x23   :  { %1126 = shalt.err (!%p1123_p1)
}
  0x24   :  { %59 = dma.hbm_to_vmem [thread:$0]  %s1412_s3, 4096, %s54_s8, [#allocation10], %s1224_s28, %s1224_s28, %s1225_s29  }
  0x25   :  { %s1127_s22 = scalar_lea.hbm %s1409_s0, 256 }
  0x26   :  { %p1128_p2 = scmp.ne.s32.totalorder %s1409_s0, %s1127_s22  ;;  %p1131_p3 = scmp.lt.u32.totalorder %s1127_s22, %s1409_s0 }
  0x28   :  { %p1133_p4 = pnand %p1131_p3, %p1128_p2 }
  0x2a   :  { %1136 = shalt.err (!%p1133_p4)
}
  0x2b   :  { %s1137_s27 = scalar_lea.vmem %s20_s10, 256  ;;  %p1142_p6 = scmp.lt.s32.totalorder %s20_s10, %s20_s10 }
  0x2c   :  { %p1138_p5 = scmp.ne.s32.totalorder %s20_s10, %s1137_s27  ;;  %p1143_p7 = scmp.lt.s32.totalorder %s1137_s27, %s1137_s27 }
  0x2e   :  { %p1144_p8 = por %p1143_p7, %p1142_p6 }
  0x30   :  { %p1145_p9 = pnand %p1144_p8, %p1138_p5 }
  0x32   :  { %1148 = shalt.err (!%p1145_p9)
}
  0x33   :  { %s1228_s3 = smov 128   ;;  %s1229_s28 = smov 8  }
  0x34   :  { %25 = dma.hbm_to_vmem [thread:$0]  %s1409_s0, 256, %s20_s10, [#allocation4], %s1228_s3, %s1228_s3, %s1229_s28  }
  0x35   :  { %s1230_s6 = smov [#allocation8]   ;;  %s1231_s8 = smov [#allocation11]  }
  0x36   :  { %s44_s7 = sshll.u32 %s1230_s6, 4  ;;  %s65_s9 = sshll.u32 %s1231_s8, 4  ;;  %s45_s7 = int_to_ptr.vmem [resolvable:$true] %s44_s7  ;;  %s66_s9 = int_to_ptr.vmem [resolvable:$true] %s65_s9 }
  0x37   :  { %s1149_s13 = scalar_lea.hbm %s1411_s2, 16 }
  0x38   :  { %p1150_p10 = scmp.ne.s32.totalorder %s1411_s2, %s1149_s13  ;;  %p1153_p11 = scmp.lt.u32.totalorder %s1149_s13, %s1411_s2 }
  0x3a   :  { %p1155_p12 = pnand %p1153_p11, %p1150_p10 }
  0x3c   :  { %1158 = shalt.err (!%p1155_p12)
}
  0x3d   :  { %s1159_s0 = scalar_lea.vmem %s45_s7, 16  ;;  %s1163_s10 = scalar_lea.vmem %s45_s7, 32 }
  0x3e   :  { %p1160_p13 = scmp.ne.s32.totalorder %s45_s7, %s1159_s0  ;;  %p1164_p0 = scmp.lt.s32.totalorder %s45_s7, %s45_s7 }
  0x3f   :  { %p1165_p1 = scmp.lt.s32.totalorder %s1163_s10, %s1159_s0 }
  0x41   :  { %p1166_p2 = por %p1165_p1, %p1164_p0 }
  0x43   :  { %p1167_p3 = pnand %p1166_p2, %p1160_p13 }
  0x45   :  { %1170 = shalt.err (!%p1167_p3)
}
  0x46   :  { %47 = dma.hbm_to_vmem [thread:$0]  %s1411_s2, 16, %s45_s7, [#allocation7]  }
  0x47   :  { %s1171_s21 = scalar_lea.hbm %s1413_s4, 64 }
  0x48   :  { %p1172_p4 = scmp.ne.s32.totalorder %s1413_s4, %s1171_s21  ;;  %p1175_p5 = scmp.lt.u32.totalorder %s1171_s21, %s1413_s4 }
  0x4a   :  { %p1177_p6 = pnand %p1175_p5, %p1172_p4 }
  0x4c   :  { %1180 = shalt.err (!%p1177_p6)
}
  0x4d   :  { %s1181_s26 = scalar_lea.vmem %s66_s9, 64  ;;  %p1186_p8 = scmp.lt.s32.totalorder %s66_s9, %s66_s9 }
  0x4e   :  { %p1182_p7 = scmp.ne.s32.totalorder %s66_s9, %s1181_s26  ;;  %p1187_p9 = scmp.lt.s32.totalorder %s1181_s26, %s1181_s26 }
  0x50   :  { %p1188_p10 = por %p1187_p9, %p1186_p8 }
  0x52   :  { %p1189_p11 = pnand %p1188_p10, %p1182_p7 }
  0x54   :  { %1192 = shalt.err (!%p1189_p11)
}
  0x55   :  { %s1232_s2 = smov 16   ;;  %s1233_s27 = smov 1  }
  0x56   :  { %71 = dma.hbm_to_vmem [thread:$0]  %s1413_s4, 64, %s66_s9, [#allocation10], %s1232_s2, %s1232_s2, %s1233_s27  }
  0x57   :  { %1215 = dma.done.wait [#allocation4], 256  }
  0x58   :  { %1216 = vsyncadd [#allocation4], 4294967040 }
  0x59   :  { %1217 = dma.done.wait [#allocation7], 2064  }
  0x5a   :  { %1218 = vsyncadd [#allocation7], 4294965232 }
  0x5b   :  { %1219 = dma.done.wait [#allocation10], 4160  }
  0x5c   :  { %1220 = vsyncadd [#allocation10], 4294963136  ;;  %v1024_v0 = vld [vmem:[#allocation6 + $0x40] sm:$0xff]   ;;  %v1026_v2 = vld [vmem:[#allocation6 + $0x48] sm:$0xff]   ;;  %v1234_v18 = vmov 0.0   ;;  %v276_v20 = vlaneseq  ;;  %vm1235_vm4 = vmmov 0  }
  0x5d   :  { %v1025_v1 = vld [vmem:[#allocation6] sm:$0xff]   ;;  %872 = vmatprep.subr.bf16.mxu0 %v1024_v0  ;;  %v1027_v3 = vld [vmem:[#allocation6 + $0x8] sm:$0xff]   ;;  %v1028_v4 = vld [vmem:[#allocation6 + $0x50] sm:$0xff]   ;;  %930 = vmatprep.subr.bf16.mxu1 %v1234_v18  ;;  %s1236_s4 = smov [#allocation12]  }
  0x5e   :  { %873 = vmatpush3.bf16.msra.mxu0 %v1025_v1  ;;  %v1029_v5 = vld [vmem:[#allocation6 + $0x10] sm:$0xff]   ;;  %v1030_v6 = vld [vmem:[#allocation6 + $0x58] sm:$0xff]   ;;  %v1032_v8 = vld [vmem:[#allocation6 + $0x60] sm:$0xff]   ;;  %v277_v21 = vand.u32 127, %v276_v20  ;;  %946 = vmatprep.mubr.msk.bf16.mxu1 %vm1235_vm4, %v1234_v18  ;;  %s801_s6 = sshll.u32 %s1236_s4, 4  ;;  %s802_s6 = int_to_ptr.vmem [resolvable:$true] %s801_s6 }
  0x5f   :  { %874 = vmatprep.subr.bf16.mxu0 %v1026_v2  ;;  %v1031_v7 = vld [vmem:[#allocation6 + $0x18] sm:$0xff]   ;;  %v1033_v9 = vld [vmem:[#allocation6 + $0x20] sm:$0xff]   ;;  %v1034_v10 = vld [vmem:[#allocation6 + $0x68] sm:$0xff]   ;;  %s1193_s7 = scalar_lea.vmem %s802_s6, 256  ;;  %p1198_p13 = scmp.lt.s32.totalorder %s802_s6, %s802_s6 }
  0x60   :  { %v1035_v11 = vld [vmem:[#allocation6 + $0x28] sm:$0xff]   ;;  %v1042_v12 = vld [vmem:[#allocation3 + $0x4] ss:$8 sps:$4 sm:$0xff]   ;;  %v1040_v17 = vld [vmem:[#allocation3] ss:$8 sps:$4 sm:$0xff]   ;;  %vm281_vm0 = vcmp.ge.s32.totalorder %v277_v21, 32  ;;  %p1194_p12 = scmp.ne.s32.totalorder %s802_s6, %s1193_s7  ;;  %p1199_p0 = scmp.lt.s32.totalorder %s1193_s7, %s1193_s7 }
  0x61   :  { %v1036_v13 = vld [vmem:[#allocation6 + $0x70] sm:$0xff]   ;;  %267 = vmatprep.mubr.bf16.mxu0 %v1042_v12  ;;  %v1038_v15 = vld [vmem:[#allocation6 + $0x78] sm:$0xff]   ;;  %v1043_v19 = vld [vmem:[#allocation9] sm:$0xff]   ;;  %vm282_vm1 = vcmp.lt.s32.totalorder %v277_v21, 64  ;;  %vm278_vm3 = vcmp.lt.s32.totalorder %v277_v21, 32 }
  0x62   :  { %875 = vmatpush3.bf16.msra.mxu0 %v1027_v3  ;;  %v1037_v14 = vld [vmem:[#allocation6 + $0x30] sm:$0xff]   ;;  %v1039_v16 = vld [vmem:[#allocation6 + $0x38] sm:$0xff]   ;;  %931 = vmatpush3.bf16.msra.mxu1 %v1043_v19  ;;  %v815_v23 = vld [vmem:[#allocation8] ss:$0 sm:$0xff]  ;;  %v1339_v31 = vsel %vm278_vm3, 1.0, %v1234_v18  ;;  %p1200_p1 = por %p1199_p0, %p1198_p13 }
  0x63   :  { %876 = vmatprep.subr.bf16.mxu0 %v1028_v4  ;;  %932 = vmatprep.subr.bf16.mxu1 %v1234_v18  ;;  %vm283_vm2 = vmand %vm281_vm0, %vm282_vm1  ;;  %v1044_v39 = vld [vmem:[#allocation9 + $0x8] sm:$0xff]   ;;  %v1045_v40 = vld [vmem:[#allocation9 + $0x10] sm:$0xff]  }
  0x64   :  { %v1336_v30 = vsel %vm283_vm2, 1.0, %v1234_v18  ;;  %v1046_v41 = vld [vmem:[#allocation9 + $0x18] sm:$0xff]   ;;  %v1047_v42 = vld [vmem:[#allocation9 + $0x20] sm:$0xff]   ;;  %v1048_v43 = vld [vmem:[#allocation9 + $0x28] sm:$0xff]   ;;  %p1201_p2 = pnand %p1200_p1, %p1194_p12 }
  0x65   :  { %v1049_v44 = vld [vmem:[#allocation9 + $0x30] sm:$0xff]   ;;  %v1050_v45 = vld [vmem:[#allocation9 + $0x38] sm:$0xff]   ;;  %v1051_v46 = vld [vmem:[#allocation9 + $0x40] sm:$0xff]  }
  0x66   :  { %877 = vmatpush3.bf16.msra.mxu0 %v1029_v5  ;;  %933 = vmatpush3.bf16.msra.mxu1 %v1044_v39  ;;  %v1052_v47 = vld [vmem:[#allocation9 + $0x48] sm:$0xff]   ;;  %v1053_v48 = vld [vmem:[#allocation9 + $0x50] sm:$0xff]   ;;  %v1054_v49 = vld [vmem:[#allocation9 + $0x58] sm:$0xff]  }
  0x67   :  { %878 = vmatprep.subr.bf16.mxu0 %v1030_v6  ;;  %934 = vmatprep.subr.bf16.mxu1 %v1234_v18  ;;  %v1055_v50 = vld [vmem:[#allocation9 + $0x60] sm:$0xff]   ;;  %v1056_v51 = vld [vmem:[#allocation9 + $0x68] sm:$0xff]   ;;  %v1062_v19 = vld [vmem:[#allocation9 + $0x98] sm:$0xff]  }
  0x68   :  { %v1063_v20 = vld [vmem:[#allocation9 + $0xa0] sm:$0xff]   ;;  %v1064_v21 = vld [vmem:[#allocation9 + $0xa8] sm:$0xff]  }
  0x69   :  { %v1072_v39 = vld [vmem:[#allocation9 + $0xe8] sm:$0xff]  }
  0x6a   :  { %879 = vmatpush3.bf16.msra.mxu0 %v1031_v7  ;;  %935 = vmatpush3.bf16.msra.mxu1 %v1045_v40  ;;  %v845_v40 = vld [vmem:[#allocation11 + $0x1] ss:$0 sm:$0xff] }
  0x6b   :  { %880 = vmatprep.subr.bf16.mxu0 %v1032_v8  ;;  %936 = vmatprep.subr.bf16.mxu1 %v1234_v18 }
  0x6e   :  { %881 = vmatpush3.bf16.msra.mxu0 %v1033_v9  ;;  %937 = vmatpush3.bf16.msra.mxu1 %v1046_v41 }
  0x6f   :  { %882 = vmatprep.subr.bf16.mxu0 %v1034_v10  ;;  %938 = vmatprep.subr.bf16.mxu1 %v1234_v18 }
  0x72   :  { %883 = vmatpush3.bf16.msra.mxu0 %v1035_v11  ;;  %939 = vmatpush3.bf16.msra.mxu1 %v1047_v42 }
  0x73   :  { %884 = vmatprep.subr.bf16.mxu0 %v1036_v13  ;;  %940 = vmatprep.subr.bf16.mxu1 %v1234_v18  ;;  %v1057_v13 = vld [vmem:[#allocation9 + $0x70] sm:$0xff]  }
  0x76   :  { %885 = vmatpush3.bf16.msra.mxu0 %v1037_v14  ;;  %941 = vmatpush3.bf16.msra.mxu1 %v1048_v43  ;;  %v1058_v14 = vld [vmem:[#allocation9 + $0x78] sm:$0xff]  }
  0x77   :  { %886 = vmatprep.subr.bf16.mxu0 %v1038_v15  ;;  %942 = vmatprep.subr.bf16.mxu1 %v1234_v18  ;;  %v1059_v15 = vld [vmem:[#allocation9 + $0x80] sm:$0xff]  }
  0x7a   :  { %887 = vmatpush3.bf16.msra.mxu0 %v1039_v16  ;;  %943 = vmatpush3.bf16.msra.mxu1 %v1049_v44  ;;  %v1060_v16 = vld [vmem:[#allocation9 + $0x88] sm:$0xff]  }
  0x7b   :  { %950 = vmatprep.subr.bf16.mxu0 %v1234_v18  ;;  %944 = vmatprep.subr.bf16.mxu1 %v1234_v18 }
  0x7d   :  { %268 = vmatmul.mubr.bf16.vlgmr.msra.gmra.mrb[0].mxu0 %v1040_v17  ;;  %v1061_v17 = vld [vmem:[#allocation9 + $0x90] sm:$0xff]  }
  0x7e   :  { %966 = vmatprep.mubr.msk.bf16.mxu0 %vm1235_vm4, %v1234_v18  ;;  %945 = vmatpush3.bf16.msra.mxu1 %v1050_v45 }
  0x7f   :  { %970 = vmatprep.subr.bf16.mxu1 %v1234_v18  ;;  %951 = vmatpush3.bf16.msra.mxu0 %v1051_v46 }
  0x80   :  { %952 = vmatprep.subr.bf16.mxu0 %v1234_v18 }
  0x83   :  { %953 = vmatpush3.bf16.msra.mxu0 %v1052_v47 }
  0x84   :  { %954 = vmatprep.subr.bf16.mxu0 %v1234_v18 }
  0x87   :  { %955 = vmatpush3.bf16.msra.mxu0 %v1053_v48 }
  0x88   :  { %956 = vmatprep.subr.bf16.mxu0 %v1234_v18 }
  0x8b   :  { %957 = vmatpush3.bf16.msra.mxu0 %v1054_v49 }
  0x8c   :  { %958 = vmatprep.subr.bf16.mxu0 %v1234_v18 }
  0x8f   :  { %959 = vmatpush3.bf16.msra.mxu0 %v1055_v50  ;;  %v1073_v50 = vld [vmem:[#allocation9 + $0xf0] sm:$0xff]  }
  0x90   :  { %960 = vmatprep.subr.bf16.mxu0 %v1234_v18 }
  0x93   :  { %961 = vmatpush3.bf16.msra.mxu0 %v1056_v51  ;;  %v1074_v51 = vld [vmem:[#allocation9 + $0xf8] sm:$0xff]  }
  0x94   :  { %962 = vmatprep.subr.bf16.mxu0 %v1234_v18 }
  0x97   :  { %963 = vmatpush3.bf16.msra.mxu0 %v1057_v13 }
  0x98   :  { %964 = vmatprep.subr.bf16.mxu0 %v1234_v18 }
  0x9b   :  { %965 = vmatpush3.bf16.msra.mxu0 %v1058_v14 }
  0x9c   :  { %990 = vmatprep.subr.bf16.mxu0 %v1234_v18 }
 0x150   :  { %v888_v22 = vpop.f32.mrb[0].mxu0 }
 0x151   :  { %v889_v24 = vpop.f32.mrb[1].mxu0 }
 0x152   :  { %v890_v25 = vadd.f32 %v889_v24, %v888_v22  ;;  %v891_v26 = vpop.f32.mrb[2].mxu0  ;;  %v836_v22 = vld [vmem:[#allocation11] ss:$0 sm:$0xff] }
 0x153   :  { %v892_v27 = vpop.f32.mrb[3].mxu0 }
 0x154   :  { %v1333_v28 = vadd.f32 %v890_v25, %v815_v23  ;;  %v893_v29 = vadd.f32 %v892_v27, %v891_v26 }
 0x156   :  { %v1341_v32 = vadd.f32 %v893_v29, %v815_v23  ;;  %v286_v33 = vmul.f32 %v1333_v28, %v1333_v28 }
 0x158   :  { %v294_v34 = vmul.f32 %v1336_v30, %v286_v33  ;;  %v288_v35 = vmul.f32 %v1339_v31, %v286_v33  ;;  %v287_v36 = vmul.f32 %v1341_v32, %v1341_v32  ;;  %v1066_v33 = vld [vmem:[#allocation9 + $0xb8] sm:$0xff]  }
 0x15a   :  { %296 = vadd.xlane.f32.xlu1 %v294_v34  ;;  %290 = vadd.xlane.f32.xlu0 %v288_v35  ;;  %v295_v37 = vmul.f32 %v1336_v30, %v287_v36  ;;  %v289_v38 = vmul.f32 %v1339_v31, %v287_v36  ;;  %v1067_v34 = vld [vmem:[#allocation9 + $0xc0] sm:$0xff]   ;;  %v1068_v35 = vld [vmem:[#allocation9 + $0xc8] sm:$0xff]   ;;  %v1069_v36 = vld [vmem:[#allocation9 + $0xd0] sm:$0xff]  }
 0x15e   :  { %298 = vadd.xlane.f32.xlu1 %v295_v37  ;;  %292 = vadd.xlane.f32.xlu0 %v289_v38  ;;  %v1070_v37 = vld [vmem:[#allocation9 + $0xd8] sm:$0xff]   ;;  %v1071_v38 = vld [vmem:[#allocation9 + $0xe0] sm:$0xff]  }
 0x1e7   :  { %v297_v52 = vpop.xlane.xlu1 %296  ;;  %v291_v53 = vpop.xlane.xlu0 %290 }
 0x1e8   :  { %v308_v54 = vmul.f32 0.03125, %v297_v52  ;;  %v300_v55 = vmul.f32 0.03125, %v291_v53  ;;  %v854_v52 = vld [vmem:[#allocation11 + $0x2] ss:$0 sm:$0xff] }
 0x1ea   :  { %v310_v56 = vadd.f32 1e-08, %v308_v54  ;;  %v302_v57 = vadd.f32 1e-08, %v300_v55 }
 0x1eb   :  { %v299_v58 = vpop.xlane.xlu1 %298  ;;  %v293_v59 = vpop.xlane.xlu0 %292 }
 0x1ec   :  { %1075 = vrsqrt.f32 %v310_v56  ;;  %v309_v60 = vmul.f32 0.03125, %v299_v58  ;;  %v301_v61 = vmul.f32 0.03125, %v293_v59 }
 0x1ed   :  { %1077 = vrsqrt.f32 %v302_v57 }
 0x1ee   :  { %v311_v62 = vadd.f32 1e-08, %v309_v60  ;;  %v303_v63 = vadd.f32 1e-08, %v301_v61 }
 0x1f0   :  { %1079 = vrsqrt.f32 %v311_v62  ;;  %v863_v62 = vld [vmem:[#allocation11 + $0x3] ss:$0 sm:$0xff] }
 0x1f1   :  { %1081 = vrsqrt.f32 %v303_v63 }
 0x1f6   :  { %v1076_v0 = vpop.eup %1075 }
 0x1f7   :  { %v1078_v1 = vpop.eup %1077  ;;  %v314_v3 = vmul.f32 %v1076_v0, %v1336_v30 }
 0x1f8   :  { %v306_v2 = vmul.f32 %v1078_v1, %v1339_v31 }
 0x1fa   :  { %v1080_v4 = vpop.eup %1079  ;;  %v316_v8 = vadd.f32 %v314_v3, %v306_v2 }
 0x1fb   :  { %v1082_v5 = vpop.eup %1081  ;;  %v315_v6 = vmul.f32 %v1080_v4, %v1336_v30 }
 0x1fc   :  { %v307_v7 = vmul.f32 %v1082_v5, %v1339_v31  ;;  %v318_v10 = vmul.f32 %v316_v8, %v1333_v28 }
 0x1fe   :  { %v317_v9 = vadd.f32 %v315_v6, %v307_v7 }
 0x200   :  { %v319_v11 = vmul.f32 %v317_v9, %v1341_v32  ;;  %v1065_v32 = vld [vmem:[#allocation9 + $0xb0] sm:$0xff]  }
 0x202   :  { %v320_v12 = vpack.c.bf16 %v319_v11, %v318_v10 }
 0x204   :  { %947 = vmatmul.mubr.bf16.vlgmr.msra.gmra.mrb[0].mxu1 %v320_v12 }
 0x205   :  { %986 = vmatprep.mubr.msk.bf16.mxu1 %vm1235_vm4, %v1234_v18  ;;  %971 = vmatpush3.bf16.msra.mxu1 %v1059_v15 }
 0x206   :  { %972 = vmatprep.subr.bf16.mxu1 %v1234_v18 }
 0x209   :  { %973 = vmatpush3.bf16.msra.mxu1 %v1060_v16 }
 0x20a   :  { %974 = vmatprep.subr.bf16.mxu1 %v1234_v18 }
 0x20d   :  { %975 = vmatpush3.bf16.msra.mxu1 %v1061_v17 }
 0x20e   :  { %976 = vmatprep.subr.bf16.mxu1 %v1234_v18 }
 0x211   :  { %977 = vmatpush3.bf16.msra.mxu1 %v1062_v19 }
 0x212   :  { %978 = vmatprep.subr.bf16.mxu1 %v1234_v18 }
 0x215   :  { %979 = vmatpush3.bf16.msra.mxu1 %v1063_v20 }
 0x216   :  { %980 = vmatprep.subr.bf16.mxu1 %v1234_v18 }
 0x219   :  { %981 = vmatpush3.bf16.msra.mxu1 %v1064_v21 }
 0x21a   :  { %982 = vmatprep.subr.bf16.mxu1 %v1234_v18 }
 0x21d   :  { %983 = vmatpush3.bf16.msra.mxu1 %v1065_v32 }
 0x21e   :  { %984 = vmatprep.subr.bf16.mxu1 %v1234_v18 }
 0x221   :  { %985 = vmatpush3.bf16.msra.mxu1 %v1066_v33 }
 0x2d7   :  { %v428_v23 = vpop.f32.mrb[0].mxu1 }
 0x2d8   :  { %v429_v24 = vadd.f32 %v836_v22, %v428_v23  ;;  %v948_v25 = vpop.f32.mrb[1].mxu1 }
 0x2d9   :  { %v431_v26 = vpop.f32.mrb[2].mxu1 }
 0x2da   :  { %v432_v27 = vadd.f32 %v836_v22, %v431_v26  ;;  %v949_v28 = vpop.f32.mrb[3].mxu1  ;;  %v435_v29 = vmax.f32 %v429_v24, 0.0 }
 0x2dc   :  { %v436_v30 = vmax.f32 %v432_v27, 0.0 }
 0x2de   :  { %v437_v31 = vpack.c.bf16 %v436_v30, %v435_v29 }
 0x2e0   :  { %967 = vmatmul.mubr.bf16.vlgmr.msra.gmra.mrb[4].mxu0 %v437_v31 }
 0x2e1   :  { %1006 = vmatprep.mubr.msk.bf16.mxu0 %vm1235_vm4, %v1234_v18  ;;  %991 = vmatpush3.bf16.msra.mxu0 %v1067_v34 }
 0x2e2   :  { %992 = vmatprep.subr.bf16.mxu0 %v1234_v18 }
 0x2e5   :  { %993 = vmatpush3.bf16.msra.mxu0 %v1068_v35 }
 0x2e6   :  { %994 = vmatprep.subr.bf16.mxu0 %v1234_v18 }
 0x2e9   :  { %995 = vmatpush3.bf16.msra.mxu0 %v1069_v36 }
 0x2ea   :  { %996 = vmatprep.subr.bf16.mxu0 %v1234_v18 }
 0x2ed   :  { %997 = vmatpush3.bf16.msra.mxu0 %v1070_v37 }
 0x2ee   :  { %998 = vmatprep.subr.bf16.mxu0 %v1234_v18 }
 0x2f1   :  { %999 = vmatpush3.bf16.msra.mxu0 %v1071_v38 }
 0x2f2   :  { %1000 = vmatprep.subr.bf16.mxu0 %v1234_v18 }
 0x2f5   :  { %1001 = vmatpush3.bf16.msra.mxu0 %v1072_v39 }
 0x2f6   :  { %1002 = vmatprep.subr.bf16.mxu0 %v1234_v18 }
 0x2f9   :  { %1003 = vmatpush3.bf16.msra.mxu0 %v1073_v50 }
 0x2fa   :  { %1004 = vmatprep.subr.bf16.mxu0 %v1234_v18 }
 0x2fd   :  { %1005 = vmatpush3.bf16.msra.mxu0 %v1074_v51 }
 0x3b3   :  { %v547_v41 = vpop.f32.mrb[4].mxu0 }
 0x3b4   :  { %v548_v42 = vadd.f32 %v845_v40, %v547_v41  ;;  %v968_v43 = vpop.f32.mrb[5].mxu0 }
 0x3b5   :  { %v550_v44 = vpop.f32.mrb[6].mxu0 }
 0x3b6   :  { %v551_v45 = vadd.f32 %v845_v40, %v550_v44  ;;  %v969_v46 = vpop.f32.mrb[7].mxu0  ;;  %v554_v47 = vmax.f32 %v548_v42, 0.0 }
 0x3b8   :  { %v555_v48 = vmax.f32 %v551_v45, 0.0 }
 0x3ba   :  { %v556_v49 = vpack.c.bf16 %v555_v48, %v554_v47 }
 0x3bc   :  { %987 = vmatmul.mubr.bf16.vlgmr.msra.gmra.mrb[4].mxu1 %v556_v49 }
 0x48f   :  { %v666_v53 = vpop.f32.mrb[4].mxu1 }
 0x490   :  { %v667_v54 = vadd.f32 %v854_v52, %v666_v53  ;;  %v988_v55 = vpop.f32.mrb[5].mxu1 }
 0x491   :  { %v669_v56 = vpop.f32.mrb[6].mxu1 }
 0x492   :  { %v670_v57 = vadd.f32 %v854_v52, %v669_v56  ;;  %v989_v58 = vpop.f32.mrb[7].mxu1  ;;  %v673_v59 = vmax.f32 %v667_v54, 0.0 }
 0x494   :  { %v674_v60 = vmax.f32 %v670_v57, 0.0 }
 0x496   :  { %v675_v61 = vpack.c.bf16 %v674_v60, %v673_v59 }
 0x498   :  { %1007 = vmatmul.mubr.bf16.vlgmr.msra.gmra.mrb[8].mxu0 %v675_v61 }
 0x56b   :  { %v785_v63 = vpop.f32.mrb[8].mxu0 }
 0x56c   :  { %v786_v0 = vadd.f32 %v863_v62, %v785_v63  ;;  %v1008_v1 = vpop.f32.mrb[9].mxu0 }
 0x56d   :  { %v788_v2 = vpop.f32.mrb[10].mxu0 }
 0x56e   :  { %v792_v18 = vmax.f32 %v786_v0, 0.0  ;;  %v789_v3 = vadd.f32 %v863_v62, %v788_v2  ;;  %v1009_v4 = vpop.f32.mrb[11].mxu0 }
 0x570   :  { %794 = vst [vmem:[#allocation12] sm:$0xff] %v792_v18  ;;  %v793_v5 = vmax.f32 %v789_v3, 0.0 }
 0x572   :  { %795 = vst [vmem:[#allocation12 + $0x8] sm:$0xff] %v793_v5 }
 0x573   :  { %1204 = shalt.err (!%p1201_p2)
}
 0x574   :  { %s1205_s11 = scalar_lea.hbm %s1414_s5, 256 }
 0x575   :  { %p1206_p3 = scmp.ne.s32.totalorder %s1414_s5, %s1205_s11  ;;  %p1209_p4 = scmp.lt.u32.totalorder %s1205_s11, %s1414_s5 }
 0x577   :  { %p1211_p5 = pnand %p1209_p4, %p1206_p3 }
 0x579   :  { %1214 = shalt.err (!%p1211_p5)
}
 0x57a   :  { %807 = dma.vmem_to_hbm [thread:$0]  %s802_s6, 256, %s1414_s5, [#allocation5], %s1228_s3, %s1228_s3, %s1229_s28  }
 0x57b   :  { %1221 = dma.done.wait [#allocation5], 256  }
 0x57c   :  { %1222 = vsyncadd [#allocation5], 4294967040 }
 0x57d   :  { %811 = vsyncpa [#allocation4], 1 }
 0x57e   :  { %812 = vsyncpa [#allocation7], 1 }
 0x57f   :  { %813 = vsyncpa [#allocation10], 1 }
 0x580   :  { %814 = vsyncpa [#allocation5], 1 }

</bundles_post_ra>
